<compile_context>
chip_gen: v7x
topology: tpu7x:2x2x1
jax: 0.10.0
libtpu: 0.0.40
codegen_flags: <defaults>
</compile_context>

<pallas_src>
import jax
import jax.numpy as jnp
from jax import lax
from jax.experimental import pallas as pl
from jax.experimental.pallas import tpu as pltpu


def _round_up(x, m):
    return (x + m - 1) // m * m


def _cross_attention_kernel(x_ref, se_ref, wq_ref, bq_ref, wkv_ref, bkv_ref,
                            o_ref, k_sc, v_sc):
    in_dt = x_ref.dtype
    dp = k_sc.shape[-1]

    # K/V depend only on the batch index: project them once per batch element
    # (query-tile index 0) with a single fused (Dp, 2*Dp) matmul, then keep the
    # results resident in VMEM scratch across all query tiles of this batch.
    @pl.when(pl.program_id(1) == 0)
    def _():
        se = se_ref[0]                                              # (Skv, Dp)
        kv = jnp.dot(se, wkv_ref[...], preferred_element_type=jnp.float32)
        kv = kv + bkv_ref[...].astype(jnp.float32)                  # (Skv, 2Dp)
        k_sc[...] = kv[:, :dp].astype(k_sc.dtype)                   # 128-aligned slice
        v_sc[...] = kv[:, dp:].astype(v_sc.dtype)

    x = x_ref[0]                                                    # (tq, Dp)
    q = jnp.dot(x, wq_ref[...], preferred_element_type=jnp.float32)
    q = q + bq_ref[...].astype(jnp.float32)                         # f32

    # attention_scores = q @ k^T: contract the last dims directly so no
    # transposed copy of K is materialized (keeps the XLU slot free).
    s = lax.dot_general(
        q.astype(in_dt), k_sc[...],
        dimension_numbers=(((1,), (1,)), ((), ())),
        preferred_element_type=jnp.float32)                         # (tq, Skv)

    # Numerically stable softmax in f32 (no 1/sqrt(D) scale, as in the module).
    s_max = jnp.max(s, axis=-1, keepdims=True)
    p = jnp.exp(s - s_max)
    denom = jnp.sum(p, axis=-1, keepdims=True)

    # P @ V with narrow-dtype operands, f32 accumulation; normalize afterwards.
    acc = jnp.dot(p.astype(in_dt), v_sc[...],
                  preferred_element_type=jnp.float32)               # (tq, Dp)

    # EUP reciprocal (otherwise-idle slot) + one Newton step for ~f32 accuracy.
    r = pl.reciprocal(denom, approx=True)
    r = r * (2.0 - denom * r)
    o_ref[0] = (acc * r).astype(o_ref.dtype)


@jax.jit
def cross_attention(x, spatial_enc, wq_t, bq, wk_t, bk, wv_t, bv):
    B, Sq, D = x.shape
    _, Skv, _ = spatial_enc.shape

    # Lane-dense feature padding; query-tile padding of Sq (sublane multiple).
    Dp = _round_up(D, 128)
    tq = min(128, _round_up(Sq, 8))
    Sqp = _round_up(Sq, tq)
    nq = Sqp // tq
    pad_d = Dp - D

    xp = jnp.pad(x, ((0, 0), (0, Sqp - Sq), (0, pad_d)))
    sep = jnp.pad(spatial_enc, ((0, 0), (0, 0), (0, pad_d)))
    wqp = jnp.pad(wq_t, ((0, pad_d), (0, pad_d)))
    bqp = jnp.pad(bq, (0, pad_d)).reshape(1, Dp)
    # Fuse K and V projection weights/biases so the per-batch projection is a
    # single MXU matmul and a single resident weight array.
    wkvp = jnp.concatenate(
        [jnp.pad(wk_t, ((0, pad_d), (0, pad_d))),
         jnp.pad(wv_t, ((0, pad_d), (0, pad_d)))], axis=1)          # (Dp, 2Dp)
    bkvp = jnp.concatenate(
        [jnp.pad(bk, (0, pad_d)),
         jnp.pad(bv, (0, pad_d))]).reshape(1, 2 * Dp)               # (1, 2Dp)

    # Rough VMEM budget: resident weights/biases + double-buffered I/O blocks
    # + K/V scratch + f32 intermediates; 2x headroom, clamped to sane bounds.
    itemsize = jnp.dtype(x.dtype).itemsize
    est = ((3 * Dp * Dp + 3 * Dp) * itemsize                        # Wq, Wkv, biases
           + 2 * (tq * Dp + Skv * Dp + tq * Dp) * itemsize          # dbl-buffered I/O
           + 2 * Skv * Dp * itemsize                                # K/V scratch
           + (2 * tq * Dp + 2 * Skv * Dp + 2 * tq * Skv) * 4)       # f32 temporaries
    vmem_limit = int(min(max(2 * est, 32 * 1024 * 1024), 128 * 1024 * 1024))

    grid_spec = pltpu.PrefetchScalarGridSpec(
        num_scalar_prefetch=0,
        grid=(B, nq),
        in_specs=[
            pl.BlockSpec((1, tq, Dp), lambda b, qi: (b, qi, 0)),     # x
            pl.BlockSpec((1, Skv, Dp), lambda b, qi: (b, 0, 0)),     # spatial_enc
            pl.BlockSpec((Dp, Dp), lambda b, qi: (0, 0)),            # Wq
            pl.BlockSpec((1, Dp), lambda b, qi: (0, 0)),             # bq
            pl.BlockSpec((Dp, 2 * Dp), lambda b, qi: (0, 0)),        # Wk|Wv fused
            pl.BlockSpec((1, 2 * Dp), lambda b, qi: (0, 0)),         # bk|bv fused
        ],
        out_specs=pl.BlockSpec((1, tq, Dp), lambda b, qi: (b, qi, 0)),
        scratch_shapes=[
            pltpu.VMEM((Skv, Dp), x.dtype),   # projected K, per-batch resident
            pltpu.VMEM((Skv, Dp), x.dtype),   # projected V, per-batch resident
        ],
    )

    out = pl.pallas_call(
        _cross_attention_kernel,
        out_shape=jax.ShapeDtypeStruct((B, Sqp, Dp), x.dtype),
        grid_spec=grid_spec,
        compiler_params=pltpu.CompilerParams(
            dimension_semantics=("parallel", "arbitrary"),
            vmem_limit_bytes=vmem_limit),
    )(xp, sep, wqp, bqp, wkvp, bkvp)

    return out[:, :Sq, :D]


def _reference(x, spatial_enc, wq_t, bq, wk_t, bk, wv_t, bv):
    q = x @ wq_t + bq
    k = spatial_enc @ wk_t + bk
    v = spatial_enc @ wv_t + bv
    s = q @ jnp.swapaxes(k, -2, -1)
    p = jax.nn.softmax(s, axis=-1)
    return p @ v


if __name__ == "__main__":
    key = jax.random.PRNGKey(0)
    B, Sq, Skv, D = 2, 8, 16, 32

    ks = jax.random.split(key, 8)
    x = jax.random.normal(ks[0], (B, Sq, D), dtype=jnp.float32)
    spatial_enc = jax.random.normal(ks[1], (B, Skv, D), dtype=jnp.float32)

    # nn.Linear(dim, dim) parameters, stored pre-transposed as (D_in, D_out).
    scale = 1.0 / jnp.sqrt(jnp.float32(D))
    wq_t = jax.random.uniform(ks[2], (D, D), jnp.float32, -scale, scale)
    wk_t = jax.random.uniform(ks[3], (D, D), jnp.float32, -scale, scale)
    wv_t = jax.random.uniform(ks[4], (D, D), jnp.float32, -scale, scale)
    bq = jax.random.uniform(ks[5], (D,), jnp.float32, -scale, scale)
    bk = jax.random.uniform(ks[6], (D,), jnp.float32, -scale, scale)
    bv = jax.random.uniform(ks[7], (D,), jnp.float32, -scale, scale)

    out = cross_attention(x, spatial_enc, wq_t, bq, wk_t, bk, wv_t, bv)
    out = jax.block_until_ready(out)

    ref = _reference(x, spatial_enc, wq_t, bq, wk_t, bk, wv_t, bv)
    assert out.shape == (B, Sq, D)
    assert jnp.allclose(out, ref, atol=2e-5, rtol=2e-5), (
        float(jnp.max(jnp.abs(out - ref))))

    print("KERNEL_OK")
</pallas_src>

<mosaic_0001>
module attributes {stable_mosaic.version = 11 : i64} {
  func.func @_cross_attention_kernel(%arg0: i32, %arg1: i32, %arg2: memref<1x8x128xf32, #tpu.memory_space<vmem>>, %arg3: memref<1x16x128xf32, #tpu.memory_space<vmem>>, %arg4: memref<128x128xf32, #tpu.memory_space<vmem>>, %arg5: memref<1x128xf32, #tpu.memory_space<vmem>>, %arg6: memref<128x256xf32, #tpu.memory_space<vmem>>, %arg7: memref<1x256xf32, #tpu.memory_space<vmem>>, %arg8: memref<1x8x128xf32, #tpu.memory_space<vmem>>, %arg9: memref<16x128xf32, #tpu.memory_space<vmem>>, %arg10: memref<16x128xf32, #tpu.memory_space<vmem>>) attributes {dimension_semantics = [#tpu.dimension_semantics<parallel>, #tpu.dimension_semantics<arbitrary>], iteration_bounds = array<i64: 2, 1>, scalar_prefetch = 0 : i64, scratch_operands = 2 : i64, tpu.core_type = #tpu.core_type<tc>, window_params = [{transform_indices = @transform_0, window_bounds = array<i64: 1, 8, 128>}, {transform_indices = @transform_1, window_bounds = array<i64: 1, 16, 128>}, {pipeline_mode = #tpu.pipeline_mode<synchronous>, transform_indices = @transform_2, window_bounds = array<i64: 128, 128>}, {pipeline_mode = #tpu.pipeline_mode<synchronous>, transform_indices = @transform_3, window_bounds = array<i64: 1, 128>}, {pipeline_mode = #tpu.pipeline_mode<synchronous>, transform_indices = @transform_4, window_bounds = array<i64: 128, 256>}, {pipeline_mode = #tpu.pipeline_mode<synchronous>, transform_indices = @transform_5, window_bounds = array<i64: 1, 256>}, {transform_indices = @transform_6, window_bounds = array<i64: 1, 8, 128>}]} {
    %c0_i32 = arith.constant 0 : i32
    %0 = arith.cmpi eq, %arg1, %c0_i32 : i32
    %1 = arith.extui %0 : i1 to i32
    %c0_i32_0 = arith.constant 0 : i32
    %2 = arith.cmpi ne, %1, %c0_i32_0 : i32
    scf.if %2 {
      %c0_19 = arith.constant 0 : index
      %c0_20 = arith.constant 0 : index
      %c0_21 = arith.constant 0 : index
      %31 = vector.load %arg3[%c0_19, %c0_20, %c0_21] : memref<1x16x128xf32, #tpu.memory_space<vmem>>, vector<1x16x128xf32>
      %32 = vector.shape_cast %31 : vector<1x16x128xf32> to vector<16x128xf32>
      %c0_22 = arith.constant 0 : index
      %c0_23 = arith.constant 0 : index
      %33 = vector.load %arg6[%c0_22, %c0_23] : memref<128x256xf32, #tpu.memory_space<vmem>>, vector<128x256xf32>
      %cst_24 = arith.constant dense<0.000000e+00> : vector<16x256xf32>
      %34 = tpu.matmul %32, %33, %cst_24 {dimension_numbers = #tpu.dot_dimension_numbers<[1], [0], [0], [1], [0, 0, 1, 1], [], []>} : vector<16x128xf32>, vector<128x256xf32>, vector<16x256xf32> -> vector<16x256xf32>
      %c0_25 = arith.constant 0 : index
      %c0_26 = arith.constant 0 : index
      %35 = vector.load %arg7[%c0_25, %c0_26] : memref<1x256xf32, #tpu.memory_space<vmem>>, vector<1x256xf32>
      %36 = vector.broadcast %35 : vector<1x256xf32> to vector<16x256xf32>
      %37 = arith.addf %34, %36 : vector<16x256xf32>
      %38 = vector.extract_strided_slice %37 {offsets = [0, 0], sizes = [16, 128], strides = [1, 1]} : vector<16x256xf32> to vector<16x128xf32>
      %c0_27 = arith.constant 0 : index
      %c0_28 = arith.constant 0 : index
      %39 = vector.load %arg9[%c0_27, %c0_28] : memref<16x128xf32, #tpu.memory_space<vmem>>, vector<16x128xf32>
      tpu.vector_store %arg9[%c0_27, %c0_28], %38 {strides = array<i32>} : memref<16x128xf32, #tpu.memory_space<vmem>>, vector<16x128xf32>,
      %40 = vector.extract_strided_slice %37 {offsets = [0, 128], sizes = [16, 128], strides = [1, 1]} : vector<16x256xf32> to vector<16x128xf32>
      %c0_29 = arith.constant 0 : index
      %c0_30 = arith.constant 0 : index
      %41 = vector.load %arg10[%c0_29, %c0_30] : memref<16x128xf32, #tpu.memory_space<vmem>>, vector<16x128xf32>
      tpu.vector_store %arg10[%c0_29, %c0_30], %40 {strides = array<i32>} : memref<16x128xf32, #tpu.memory_space<vmem>>, vector<16x128xf32>,
    } else {
    }
    %c0 = arith.constant 0 : index
    %c0_1 = arith.constant 0 : index
    %c0_2 = arith.constant 0 : index
    %3 = vector.load %arg2[%c0, %c0_1, %c0_2] : memref<1x8x128xf32, #tpu.memory_space<vmem>>, vector<1x8x128xf32>
    %4 = vector.shape_cast %3 : vector<1x8x128xf32> to vector<8x128xf32>
    %c0_3 = arith.constant 0 : index
    %c0_4 = arith.constant 0 : index
    %5 = vector.load %arg4[%c0_3, %c0_4] : memref<128x128xf32, #tpu.memory_space<vmem>>, vector<128x128xf32>
    %cst = arith.constant dense<0.000000e+00> : vector<8x128xf32>
    %6 = tpu.matmul %4, %5, %cst {dimension_numbers = #tpu.dot_dimension_numbers<[1], [0], [0], [1], [0, 0, 1, 1], [], []>} : vector<8x128xf32>, vector<128x128xf32>, vector<8x128xf32> -> vector<8x128xf32>
    %c0_5 = arith.constant 0 : index
    %c0_6 = arith.constant 0 : index
    %7 = vector.load %arg5[%c0_5, %c0_6] : memref<1x128xf32, #tpu.memory_space<vmem>>, vector<1x128xf32>
    %8 = vector.broadcast %7 : vector<1x128xf32> to vector<8x128xf32>
    %9 = arith.addf %6, %8 : vector<8x128xf32>
    %c0_7 = arith.constant 0 : index
    %c0_8 = arith.constant 0 : index
    %10 = vector.load %arg9[%c0_7, %c0_8] : memref<16x128xf32, #tpu.memory_space<vmem>>, vector<16x128xf32>
    %cst_9 = arith.constant dense<0.000000e+00> : vector<8x16xf32>
    %11 = tpu.matmul %9, %10, %cst_9 {dimension_numbers = #tpu.dot_dimension_numbers<[1], [1], [0], [0], [0, 0, 1, 0], [], []>} : vector<8x128xf32>, vector<16x128xf32>, vector<8x16xf32> -> vector<8x16xf32>
    %cst_10 = arith.constant dense<0xFF800000> : vector<8xf32>
    %12 = vector.multi_reduction <maximumf>, %11, %cst_10 [1] : vector<8x16xf32> to vector<8xf32>
    %13 = vector.shape_cast %12 : vector<8xf32> to vector<8x1xf32>
    %14 = vector.broadcast %13 : vector<8x1xf32> to vector<8x16xf32>
    %15 = arith.subf %11, %14 : vector<8x16xf32>
    %16 = math.exp %15 : vector<8x16xf32>
    %cst_11 = arith.constant dense<0.000000e+00> : vector<8xf32>
    %17 = vector.multi_reduction <add>, %16, %cst_11 [1] : vector<8x16xf32> to vector<8xf32>
    %18 = vector.shape_cast %17 : vector<8xf32> to vector<8x1xf32>
    %c0_12 = arith.constant 0 : index
    %c0_13 = arith.constant 0 : index
    %19 = vector.load %arg10[%c0_12, %c0_13] : memref<16x128xf32, #tpu.memory_space<vmem>>, vector<16x128xf32>
    %cst_14 = arith.constant dense<0.000000e+00> : vector<8x128xf32>
    %20 = tpu.matmul %16, %19, %cst_14 {dimension_numbers = #tpu.dot_dimension_numbers<[1], [0], [0], [1], [0, 0, 1, 1], [], []>} : vector<8x16xf32>, vector<16x128xf32>, vector<8x128xf32> -> vector<8x128xf32>
    %21 = tpu.reciprocal %18 {approx = true} : vector<8x1xf32> -> vector<8x1xf32>
    %22 = arith.mulf %18, %21 : vector<8x1xf32>
    %cst_15 = arith.constant 2.000000e+00 : f32
    %23 = vector.broadcast %cst_15 : f32 to vector<8x1xf32>
    %24 = arith.subf %23, %22 : vector<8x1xf32>
    %25 = arith.mulf %21, %24 : vector<8x1xf32>
    %26 = vector.broadcast %25 : vector<8x1xf32> to vector<8x128xf32>
    %27 = arith.mulf %20, %26 : vector<8x128xf32>
    %c0_16 = arith.constant 0 : index
    %c0_17 = arith.constant 0 : index
    %c0_18 = arith.constant 0 : index
    %28 = vector.load %arg8[%c0_16, %c0_17, %c0_18] : memref<1x8x128xf32, #tpu.memory_space<vmem>>, vector<1x8x128xf32>
    %29 = vector.shape_cast %28 : vector<1x8x128xf32> to vector<8x128xf32>
    %30 = vector.shape_cast %27 : vector<8x128xf32> to vector<1x8x128xf32>
    tpu.vector_store %arg8[%c0_16, %c0_17, %c0_18], %30 {strides = array<i32>} : memref<1x8x128xf32, #tpu.memory_space<vmem>>, vector<1x8x128xf32>,
    return
  }
  func.func @transform_0(%arg0: i32, %arg1: i32) -> (i32, i32, i32) {
    %c0_i32 = arith.constant 0 : i32
    %c0_i32_0 = arith.constant 0 : i32
    return %arg0, %arg1, %c0_i32 : i32, i32, i32
  }
  func.func @transform_1(%arg0: i32, %arg1: i32) -> (i32, i32, i32) {
    %c0_i32 = arith.constant 0 : i32
    %c0_i32_0 = arith.constant 0 : i32
    %c0_i32_1 = arith.constant 0 : i32
    return %arg0, %c0_i32, %c0_i32_0 : i32, i32, i32
  }
  func.func @transform_2(%arg0: i32, %arg1: i32) -> (i32, i32) {
    %c0_i32 = arith.constant 0 : i32
    %c0_i32_0 = arith.constant 0 : i32
    %c0_i32_1 = arith.constant 0 : i32
    return %c0_i32, %c0_i32_0 : i32, i32
  }
  func.func @transform_3(%arg0: i32, %arg1: i32) -> (i32, i32) {
    %c0_i32 = arith.constant 0 : i32
    %c0_i32_0 = arith.constant 0 : i32
    %c0_i32_1 = arith.constant 0 : i32
    return %c0_i32, %c0_i32_0 : i32, i32
  }
  func.func @transform_4(%arg0: i32, %arg1: i32) -> (i32, i32) {
    %c0_i32 = arith.constant 0 : i32
    %c0_i32_0 = arith.constant 0 : i32
    %c0_i32_1 = arith.constant 0 : i32
    return %c0_i32, %c0_i32_0 : i32, i32
  }
  func.func @transform_5(%arg0: i32, %arg1: i32) -> (i32, i32) {
    %c0_i32 = arith.constant 0 : i32
    %c0_i32_0 = arith.constant 0 : i32
    %c0_i32_1 = arith.constant 0 : i32
    return %c0_i32, %c0_i32_0 : i32, i32
  }
  func.func @transform_6(%arg0: i32, %arg1: i32) -> (i32, i32, i32) {
    %c0_i32 = arith.constant 0 : i32
    %c0_i32_0 = arith.constant 0 : i32
    return %arg0, %arg1, %c0_i32 : i32, i32, i32
  }
}

</mosaic_0001>

<bundles_post_ra>
// kernel: cross_attention.1
= control target key start
LH: loop header
LB: loop body
LE: loop exit
PB: predicated region body
PF: predicated region fallthrough
CT: control target
= control target key end

     0   :  { %11 = vsyncpa [#allocation5], 0  ;;  %s1398_s0 = inlined_call_operand.vmem [shape: f32[2,8,128], index: 0, kind: input, shape index: {}]   ;;  %s1399_s1 = inlined_call_operand.vmem [shape: f32[2,16,128], index: 1, kind: input, shape index: {}]   ;;  %s1400_s2 = inlined_call_operand.vmem [shape: f32[128,128], index: 2, kind: input, shape index: {}]   ;;  %s1401_s3 = inlined_call_operand.vmem [shape: f32[1,128], index: 3, kind: input, shape index: {}]   ;;  %s1402_s4 = inlined_call_operand.vmem [shape: f32[128,256], index: 4, kind: input, shape index: {}]   ;;  %s1403_s5 = inlined_call_operand.vmem [shape: f32[1,256], index: 5, kind: input, shape index: {}]   ;;  %s1404_s6 = inlined_call_operand.hbm [shape: f32[2,8,128], index: 6, kind: output, shape index: {}]  }
   0x1   :  { %13 = vsyncpa [#allocation5 + $0x1], 0  ;;  %s1109_s21 = smov 0   ;;  %s1111_s22 = smov 0  }
   0x2   :  { %s1113_s23 = smov 0   ;;  %s1115_s24 = smov 0  }
   0x3   :  { %s1117_s25 = smov 0   ;;  %s1119_s26 = smov 0  }
   0x4 LB: > { %s778_s27 = sadd.s32 4294967295, %s1068_s26   ;;  %s779_s28 = sadd.s32 4294967294, %s1068_s26   ;;  %s1068_s26 = sphi %s1119_s26, %s19_s26   ;;  %s1064_s25 = sphi %s1117_s25, %s1411_s25   ;;  %s1060_s24 = sphi %s1115_s24, %s1410_s24   ;;  %s1056_s23 = sphi %s1113_s23, %s1409_s23   ;;  %s1052_s22 = sphi %s1111_s22, %s1408_s22   ;;  %s1048_s21 = sphi %s1109_s21, %s1407_s21  }
   0x5   : > { %s31_s29 = sadd.s32 1, %s1064_s25  ;;  %s178_s30 = sadd.s32 1, %s1056_s23 }
   0x6   : > { %p33_p0 = scmp.ge.s32.totalorder %s31_s29, 2  ;;  %p188_p1 = scmp.ne.s32.totalorder %s1056_s23, %s1052_s22 }
   0x7   : > { %p189_p2 = scmp.eq.s32.totalorder %s778_s27, 1  ;;  %p194_p3 = scmp.ne.s32.totalorder %s1052_s22, %s1048_s21 }
   0x8   : > { %s1413_s29 = smov (%p33_p0, %s31_s29), 0  ;;  %p195_p5 = scmp.eq.s32.totalorder %s779_s28, 1 }
   0x9   : > { %p1149_p4 = por %p189_p2, %p188_p1  ;;  %s173_s8 = ssub.s32 %s1064_s25, %s1413_s29 }
   0xa   : > { %p782_p6 = scmp.ge.s32.totalorder %s1068_s26, 1  ;;  %p176_p7 = scmp.eq.s32.totalorder %s173_s8, 0 }
   0xb   : > { %p1156_p8 = por %p195_p5, %p194_p3  ;;  %p243_p9 = scmp.lt.s32.totalorder %s1068_s26, 3 }
   0xc   : > { %s1162_s10 = scalar_select %p176_p7, %s1056_s23, %s178_s30  }
   0xd   : > { %p244_p10 = pnand %p782_p6, %p243_p9 }
   0xe   : > { %v299_v0 = vld [vmem:[%s1402_s4 + $0x8] sm:$0xff] (!%p244_p10)  ;;  %v301_v1 = vld [vmem:[%s1402_s4 + $0x18] sm:$0xff] (!%p244_p10)  ;;  %v298_v2 = vld [vmem:[%s1402_s4] sm:$0xff] (!%p244_p10)  ;;  %v1070_v7 = vmov (!%p244_p10), 0.0|0.0   ;;  %v1071_v8 = vmov (!%p244_p10), 0.0   ;;  %vm1072_vm0 = vmmov (!%p244_p10), 0  }
   0xf   : > { %247 = sbr.rel (%p244_p10) target bundleno = 874 (0x36a), region = 44  ;;  %v866_v3 = vpack.c.bf16 (!%p244_p10), %v301_v1, %v299_v0  ;;  %v300_v4 = vld [vmem:[%s1402_s4 + $0x10] sm:$0xff] (!%p244_p10)  ;;  %v303_v5 = vld [vmem:[%s1402_s4 + $0x28] sm:$0xff] (!%p244_p10)  ;;  %v305_v6 = vld [vmem:[%s1402_s4 + $0x38] sm:$0xff] (!%p244_p10)  ;;  %898 = vmatprep.subr.bf16.mxu1 (!%p244_p10), %v1070_v7  ;;  %406 = vmatprep.mubr.f32.mxu0 (!%p244_p10), %v1071_v8  ;;  %p280_p11 = scmp.lt.s32.totalorder (!%p244_p10), %s1060_s24, 1  ;;  %vm589_vm1 = vcmask (!%p244_p10), 130048  }
  0x10   : > { %v868_v9 = vpack.c.bf16 (!%p244_p10), %v300_v4, %v298_v2  ;;  %v870_v10 = vpack.c.bf16 (!%p244_p10), %v305_v6, %v303_v5  ;;  %v302_v11 = vld [vmem:[%s1402_s4 + $0x20] sm:$0xff] (!%p244_p10)  ;;  %v304_v12 = vld [vmem:[%s1402_s4 + $0x30] sm:$0xff] (!%p244_p10)  ;;  %v307_v13 = vld [vmem:[%s1402_s4 + $0x48] sm:$0xff] (!%p244_p10)  ;;  %849 = vmatprep.mubr.msk.f32.mxu1 (!%p244_p10), %vm1072_vm0, %v1071_v8  ;;  %s277_s28 = sand.u32 (!%p244_p10), 1, %s1052_s22   ;;  %s790_s8 = sshll.u32 (!%p244_p10), %s1060_s24, 7 }
  0x11   : > { %867 = vmatprep.subr.bf16.mxu0 (!%p244_p10), %v866_v3  ;;  %v309_v14 = vld [vmem:[%s1402_s4 + $0x58] sm:$0xff] (!%p244_p10)  ;;  %v872_v15 = vpack.c.bf16 (!%p244_p10), %v304_v12, %v302_v11  ;;  %v306_v16 = vld [vmem:[%s1402_s4 + $0x40] sm:$0xff] (!%p244_p10)  ;;  %v308_v18 = vld [vmem:[%s1402_s4 + $0x50] sm:$0xff] (!%p244_p10)  ;;  %s1351_s16 = scalar_lea.hbm (!%p244_p10), %s1404_s6, %s790_s8  ;;  %s681_s17 = scalar_lea.sflag (!%p244_p10), [#allocation5], %s277_s28 }
  0x12   : > { %869 = vmatpush1.bf16.msra.mxu0 (!%p244_p10), %v868_v9  ;;  %v874_v17 = vpack.c.bf16 (!%p244_p10), %v309_v14, %v307_v13  ;;  %v424_v19 = vld [vmem:[%s1400_s2] sm:$0xff] (!%p244_p10)  ;;  %v425_v20 = vld [vmem:[%s1400_s2 + $0x8] sm:$0xff] (!%p244_p10)  ;;  %v313_v22 = vld [vmem:[%s1402_s4 + $0x78] sm:$0xff] (!%p244_p10)  ;;  %v876_v26 = vpack.c.bf16 (!%p244_p10), %v308_v18, %v306_v16 }
  0x13   : > { %871 = vmatprep.subr.bf16.mxu0 (!%p244_p10), %v870_v10  ;;  %v311_v21 = vld [vmem:[%s1402_s4 + $0x68] sm:$0xff] (!%p244_p10)  ;;  %v899_v23 = vpack.c.bf16 (!%p244_p10), %v425_v20, %v424_v19  ;;  %v426_v24 = vld [vmem:[%s1400_s2 + $0x10] sm:$0xff] (!%p244_p10)  ;;  %v427_v25 = vld [vmem:[%s1400_s2 + $0x18] sm:$0xff] (!%p244_p10) }
  0x14   : > { %v310_v27 = vld [vmem:[%s1402_s4 + $0x60] sm:$0xff] (!%p244_p10)  ;;  %v902_v28 = vpack.c.bf16 (!%p244_p10), %v427_v25, %v426_v24  ;;  %v878_v29 = vpack.c.bf16 (!%p244_p10), %v313_v22, %v311_v21  ;;  %v312_v30 = vld [vmem:[%s1402_s4 + $0x70] sm:$0xff] (!%p244_p10)  ;;  %v429_v32 = vld [vmem:[%s1400_s2 + $0x28] sm:$0xff] (!%p244_p10) }
  0x15   : > { %900 = vmatpush3.bf16.msra.mxu1 (!%p244_p10), %v899_v23  ;;  %v428_v31 = vld [vmem:[%s1400_s2 + $0x20] sm:$0xff] (!%p244_p10)  ;;  %v315_v33 = vld [vmem:[%s1402_s4 + $0x88] sm:$0xff] (!%p244_p10)  ;;  %v317_v34 = vld [vmem:[%s1402_s4 + $0x98] sm:$0xff] (!%p244_p10)  ;;  %v880_v35 = vpack.c.bf16 (!%p244_p10), %v312_v30, %v310_v27 }
  0x16   : > { %873 = vmatpush1.bf16.msra.mxu0 %v872_v15  ;;  %901 = vmatprep.subr.bf16.mxu1 %v1070_v7  ;;  %v314_v36 = vld [vmem:[%s1402_s4 + $0x80] sm:$0xff]  ;;  %v905_v37 = vpack.c.bf16 %v429_v32, %v428_v31  ;;  %v882_v38 = vpack.c.bf16 %v317_v34, %v315_v33  ;;  %v316_v39 = vld [vmem:[%s1402_s4 + $0x90] sm:$0xff]  ;;  %v431_v41 = vld [vmem:[%s1400_s2 + $0x38] sm:$0xff]  ;;  %s1302_s11 = scalar_select %p280_p11, %s1060_s24, 1  ;;  %v332_v15 = vlaneseq }
  0x17   : > { %875 = vmatprep.subr.bf16.mxu0 %v874_v17  ;;  %v430_v40 = vld [vmem:[%s1400_s2 + $0x30] sm:$0xff]  ;;  %v319_v42 = vld [vmem:[%s1402_s4 + $0xa8] sm:$0xff]  ;;  %v321_v43 = vld [vmem:[%s1402_s4 + $0xb8] sm:$0xff]  ;;  %v884_v44 = vpack.c.bf16 %v316_v39, %v314_v36  ;;  %s1073_s24 = smov [#allocation4]  }
  0x18   : > { %v318_v45 = vld [vmem:[%s1402_s4 + $0xa0] sm:$0xff]  ;;  %v908_v46 = vpack.c.bf16 %v431_v41, %v430_v40  ;;  %v886_v47 = vpack.c.bf16 %v321_v43, %v319_v42  ;;  %v320_v48 = vld [vmem:[%s1402_s4 + $0xb0] sm:$0xff]  ;;  %v433_v50 = vld [vmem:[%s1400_s2 + $0x48] sm:$0xff]  ;;  %s793_s20 = sshll.u32 %s1302_s11, 4  ;;  %s784_s15 = sshll.u32 %s1302_s11, 3  ;;  %v333_v16 = vshrl.u32 %v332_v15, 7 }
  0x19   : > { %903 = vmatpush3.bf16.msra.mxu1 %v902_v28  ;;  %v432_v49 = vld [vmem:[%s1400_s2 + $0x40] sm:$0xff]  ;;  %v323_v51 = vld [vmem:[%s1402_s4 + $0xc8] sm:$0xff]  ;;  %v325_v52 = vld [vmem:[%s1402_s4 + $0xd8] sm:$0xff]  ;;  %v888_v53 = vpack.c.bf16 %v320_v48, %v318_v45  ;;  %s291_s30 = scalar_lea.vmem %s1399_s1, %s793_s20  ;;  %s286_s18 = scalar_lea.vmem %s1398_s0, %s784_s15 }
  0x1a   : > { %877 = vmatpush1.bf16.msra.mxu0 %v876_v26  ;;  %904 = vmatprep.subr.bf16.mxu1 %v1070_v7  ;;  %v322_v54 = vld [vmem:[%s1402_s4 + $0xc0] sm:$0xff]  ;;  %v911_v55 = vpack.c.bf16 %v433_v50, %v432_v49  ;;  %v890_v56 = vpack.c.bf16 %v325_v52, %v323_v51  ;;  %v324_v57 = vld [vmem:[%s1402_s4 + $0xd0] sm:$0xff]  ;;  %v435_v59 = vld [vmem:[%s1400_s2 + $0x58] sm:$0xff]  ;;  %v334_v17 = vsub.s32 0, %v333_v16  ;;  %v338_v19 = vsub.s32 1, %v333_v16  ;;  %s994_s11 = sshll.u32 %s1073_s24, 4  ;;  %s995_s11 = int_to_ptr.vmem [resolvable:$false] %s994_s11 }
  0x1b   : > { %879 = vmatprep.subr.bf16.mxu0 %v878_v29  ;;  %v434_v58 = vld [vmem:[%s1400_s2 + $0x50] sm:$0xff]  ;;  %v327_v60 = vld [vmem:[%s1402_s4 + $0xe8] sm:$0xff]  ;;  %v329_v61 = vld [vmem:[%s1402_s4 + $0xf8] sm:$0xff]  ;;  %v892_v62 = vpack.c.bf16 %v324_v57, %v322_v54  ;;  %s996_s19 = scalar_lea.vmem %s995_s11, 256 }
  0x1c   : > { %v326_v63 = vld [vmem:[%s1402_s4 + $0xe0] sm:$0xff]  ;;  %v914_v0 = vpack.c.bf16 %v435_v59, %v434_v58  ;;  %v894_v1 = vpack.c.bf16 %v329_v61, %v327_v60  ;;  %v328_v2 = vld [vmem:[%s1402_s4 + $0xf0] sm:$0xff]  ;;  %v437_v4 = vld [vmem:[%s1400_s2 + $0x68] sm:$0xff] }
  0x1d   : > { %906 = vmatpush3.bf16.msra.mxu1 %v905_v37  ;;  %v436_v3 = vld [vmem:[%s1400_s2 + $0x60] sm:$0xff]  ;;  %v896_v5 = vpack.c.bf16 %v328_v2, %v326_v63  ;;  %v438_v9 = vld [vmem:[%s1400_s2 + $0x70] sm:$0xff]  ;;  %v439_v10 = vld [vmem:[%s1400_s2 + $0x78] sm:$0xff] }
  0x1e   : > { %881 = vmatpush1.bf16.msra.mxu0 %v880_v35  ;;  %907 = vmatprep.subr.bf16.mxu1 %v1070_v7  ;;  %v917_v6 = vpack.c.bf16 %v437_v4, %v436_v3  ;;  %v296_v11 = vld [vmem:[%s291_s30] sm:$0xff]  ;;  %v920_v12 = vpack.c.bf16 %v439_v10, %v438_v9  ;;  %v297_v13 = vld [vmem:[%s291_s30 + $0x8] sm:$0xff]  ;;  %s783_s30 = sshll.u32 %s277_s28, 3 }
  0x1f   : > { %883 = vmatprep.subr.bf16.mxu0 %v882_v38  ;;  %v423_v14 = vld [vmem:[%s286_s18] sm:$0xff]  ;;  %s279_s12 = scalar_lea.vmem [#allocation4], %s783_s30 }
  0x20   : > { %v330_v18 = vld [vmem:[%s1403_s5] sm:$0x3]  ;;  %s695_s13 = sshll.u32 %s279_s12, 4  ;;  %s1353_s13 = int_to_ptr.vmem [resolvable:$true] %s695_s13 }
  0x21   : > { %909 = vmatpush3.bf16.msra.mxu1 %v908_v46  ;;  %v335_v21 = vrot.slane %v330_v18, %v334_v17  ;;  %v787_v32 = vld [vmem:[%s1401_s3] ss:$0 sm:$0xff]  ;;  %s990_s18 = scalar_lea.vmem %s1353_s13, 128  ;;  %p997_p1 = scmp.lt.s32.totalorder %s1353_s13, %s995_s11 }
  0x22   : > { %885 = vmatpush1.bf16.msra.mxu0 %v884_v44  ;;  %910 = vmatprep.subr.bf16.mxu1 %v1070_v7  ;;  %p991_p12 = scmp.ne.s32.totalorder %s1353_s13, %s990_s18  ;;  %p998_p2 = scmp.lt.s32.totalorder %s996_s19, %s990_s18 }
  0x23   : > { %887 = vmatprep.subr.bf16.mxu0 %v886_v47 }
  0x24   : > { %p992_p13 = pnand %p991_p12, %p1149_p4  ;;  %p999_p3 = por %p998_p2, %p997_p1 }
  0x25   : > { %912 = vmatpush3.bf16.msra.mxu1 %v911_v55 }
  0x26   : > { %889 = vmatpush1.bf16.msra.mxu0 %v888_v53  ;;  %913 = vmatprep.subr.bf16.mxu1 %v1070_v7  ;;  %p993_p0 = pneg %p992_p13 }
  0x27   : > { %891 = vmatprep.subr.bf16.mxu0 %v890_v56 }
  0x28   : > { %p1000_p5 = pnand %p999_p3, %p993_p0 }
  0x29   : > { %915 = vmatpush3.bf16.msra.mxu1 %v914_v0 }
  0x2a   : > { %893 = vmatpush1.bf16.msra.mxu0 %v892_v62  ;;  %916 = vmatprep.subr.bf16.mxu1 %v1070_v7 }
  0x2b   : > { %895 = vmatprep.subr.bf16.mxu0 %v894_v1 }
  0x2d   : > { %918 = vmatpush3.bf16.msra.mxu1 %v917_v6 }
  0x2e   : > { %897 = vmatpush1.bf16.msra.mxu0 %v896_v5  ;;  %919 = vmatprep.subr.bf16.mxu1 %v1070_v7 }
  0x2f   : > { %922 = vmatprep.subr.bf16.mxu0 %v1070_v7 }
  0x31   : > { %407 = vmatmul.mubr.f32.vlgmr.msra.gmra.mrb[0].mxu0 %v296_v11  ;;  %921 = vmatpush3.bf16.msra.mxu1 %v920_v12 }
  0x32   : > { %412 = vmatprep.mubr.f32.mxu0 %v1071_v8  ;;  %925 = vmatprep.subr.bf16.mxu1 %v1070_v7  ;;  %v339_v7 = vrot.slane %v330_v18, %v338_v19 }
  0x34   : > { %850 = vmatmul.mubr.f32.vlgmr.msra.gmra.mrb[0].mxu1 %v423_v14 }
  0x35   : > { %413 = vmatmul.mubr.f32.gmra.mrb[2].mxu0 %v297_v13  ;;  %863 = vmatprep.mubr.msk.f32.mxu1 %vm1072_vm0, %v1071_v8 }
  0x36   : > { %856 = vmatprep.mubr.msk.f32.mxu0 %vm1072_vm0, %v1071_v8 }
 0x104   : > { %v408_v20 = vpop.f32.mrb[0].mxu0 }
 0x105   : > { %v410_v22 = vpop.f32.mrb[1].mxu0  ;;  %v409_v25 = vadd.f32 %v408_v20, %v335_v21 }
 0x106   : > { %v411_v29 = vadd.f32 %v410_v22, %v339_v7 }
 0x107   : > { %v513_v24 = vpop.f32.mrb[0].mxu1 }
 0x108   : > { %v414_v23 = vpop.f32.mrb[2].mxu0  ;;  %v851_v28 = vpop.f32.mrb[1].mxu1  ;;  %v514_v33 = vadd.f32 %v787_v32, %v513_v24 }
 0x109   : > { %v415_v26 = vadd.f32 %v414_v23, %v335_v21  ;;  %v416_v27 = vpop.f32.mrb[3].mxu0 }
 0x10a   : > { %v417_v8 = vadd.f32 %v416_v27, %v339_v7 }
 0x10b   : > { %v923_v30 = vpack.c.bf16 %v415_v26, %v409_v25 }
 0x10c   : > { %v926_v31 = vpack.c.bf16 %v417_v8, %v411_v29 }
 0x10d   : > { %924 = vmatpush3.bf16.xpose.msra.mxu0 %v923_v30 }
 0x10e   : > { %927 = vmatpush3.bf16.msra.mxu1 %v926_v31 }
 0x114   : > { %857 = vmatmul.mubr.f32.vlgmr.msra.gmra.mrb[4].mxu0 %v514_v33 }
 0x1e7   : > { %v585_v34 = vpop.f32.mrb[4].mxu0 }
 0x1e8   : > { %v858_v35 = vpop.f32.mrb[5].mxu0  ;;  %v590_v36 = vsel %vm589_vm1, %v585_v34, -inf }
 0x1e9   : > { %591 = vmax.xlane.f32.xlu0 %v590_v36 }
 0x276   : > { %v592_v37 = vpop.xlane.xlu0 %591 }
 0x277   : > { %v593_v38 = vsub.f32 %v585_v34, %v592_v37 }
 0x279   : > { %v594_v39 = vmul.f32 1.442695, %v593_v38 }
 0x27b   : > { %986 = vpow2.f32 %v594_v39 }
 0x285   : > { %v987_v40 = vpop.eup %986 }
 0x286   : > { %864 = vmatmul.mubr.msk.f32.vlgmr.msra.gmra.mrb[2].mxu1 %vm589_vm1, %v987_v40  ;;  %v596_v41 = vsel %vm589_vm1, %v987_v40, 0.0 }
 0x287   : > { %597 = vadd.xlane.f32.xlu0 %v596_v41 }
 0x314   : > { %v598_v42 = vpop.xlane.xlu0 %597 }
 0x315   : > { %988 = vrcp.f32 %v598_v42 }
 0x31f   : > { %v989_v43 = vpop.eup %988 }
 0x320   : > { %v675_v44 = vmul.f32 %v989_v43, %v598_v42 }
 0x322   : > { %v676_v45 = vsub.f32 2.0, %v675_v44 }
 0x324   : > { %v677_v46 = vmul.f32 %v989_v43, %v676_v45 }
 0x359   : > { %v670_v47 = vpop.f32.mrb[2].mxu1 }
 0x35a   : > { %v678_v48 = vmul.f32 %v677_v46, %v670_v47  ;;  %v865_v49 = vpop.f32.mrb[3].mxu1 }
 0x35c   : > { %679 = vst [vmem:[%s279_s12] sm:$0xff] %v678_v48 }
 0x35d   : > { %1003 = shalt.err (!%p1000_p5)
}
 0x35e   : > { %s1004_s20 = scalar_lea.hbm %s1351_s16, 128  ;;  %s1008_s30 = scalar_lea.hbm %s1404_s6, 256 }
 0x35f   : > { %p1005_p6 = scmp.ne.s32.totalorder %s1351_s16, %s1004_s20  ;;  %p1009_p10 = scmp.lt.u32.totalorder %s1351_s16, %s1404_s6 }
 0x360   : > { %p1010_p11 = scmp.lt.u32.totalorder %s1008_s30, %s1004_s20  ;;  %p1012_p13 = scmp.lt.u32.totalorder %s1004_s20, %s1351_s16 }
 0x361   : > { %p1006_p7 = pnand %p1005_p6, %p1149_p4 }
 0x362   : > { %p1011_p12 = por %p1010_p11, %p1009_p10 }
 0x363   : > { %p1007_p9 = pneg %p1006_p7 }
 0x364   : > { %p1013_p0 = por %p1012_p13, %p1011_p12 }
 0x366   : > { %p1014_p1 = pnand %p1013_p0, %p1007_p9 }
 0x368   : > { %1017 = shalt.err (!%p1014_p1)
}
 0x369   : > { %928 = dma.vmem_to_hbm [thread:$0]  (%p1149_p4), %s1353_s13, 128, %s1351_s16, %s681_s17  }
 0x36a PF: > { %p934_p2 = scmp.ge.s32.totalorder %s1068_s26, 2  ;;  %s707_s14 = sand.u32 1, %s1048_s21  }
 0x36b   : > { %s708_s15 = scalar_lea.sflag [#allocation5], %s707_s14 }
 0x36c   : > { %p931_p3 = pnand %p934_p2, %p1156_p8 }
 0x36e   : > { %1043 = dma.done.wait (!%p931_p3), %s708_s15, 128  }
 0x36f   : > { %1045 = vsyncadd (!%p931_p3), %s708_s15, 4294967168  ;;  %s19_s26 = sadd.s32 1, %s1068_s26   ;;  %s1407_s21 = smov %s1052_s22 }
 0x370   : > { %p16_p5 = scmp.ge.s32.totalorder %s19_s26, 4   ;;  %s1408_s22 = smov %s1056_s23 }
 0x371   : > { %s1409_s23 = smov %s1162_s10  ;;  %s1410_s24 = smov %s1064_s25 }
 0x372   : > { %s1411_s25 = smov %s1413_s29  ;;  %18 = sbr.rel (!%p16_p5) target bundleno = 4 (0x4), region = 86 }
 0x379   :  { %713 = vsyncpa [#allocation5], 1 }
 0x37a   :  { %715 = vsyncpa [#allocation5 + $0x1], 1 }

</bundles_post_ra>
